<compile_context>
chip_gen: v5e
topology: v5e:2x2
jax: 0.10.0
libtpu: 0.0.40
codegen_flags: <defaults>
</compile_context>

<pallas_src>
import functools
import numpy as np
import jax
import jax.numpy as jnp
from jax.scipy.special import logsumexp
from jax.experimental import pallas as pl
from jax.experimental.pallas import tpu as pltpu

# ----- model hyper-parameters (small, deterministic, consistent with the module) -----
HIDDEN = 64          # config.hidden_size
EMB = 64             # emb_size (== hidden_size, required by head_extractor2's hidden*3 input)
BLOCK = 16           # block_size
GROUPS = EMB // BLOCK
NUM_CLASS = 8        # config.num_labels
NUM_HEADS = 2
DOC_LEN = 128
LANE = 128           # lane-dense output / padding width
VMEM_LIMIT = 48 * 1024 * 1024
EVI_THRESH = 0.2     # unused under this forward configuration (sent_labels=None)


def _round_up(x, m):
    return ((x + m - 1) // m) * m


def _pad_rows(x, p):
    return jnp.pad(x, ((0, p - x.shape[0]),) + ((0, 0),) * (x.ndim - 1))


# =====================================================================================
# Kernel 1: localized context pooling, tiled over (batch, pair-tile)
#   heads-leading attention layout (n, nH, Pmax, L) -> full (P,L) vreg tiles,
#   head mean is a couple of VPU adds, normalization uses the EUP reciprocal,
#   att @ seq is a single K=L bf16 matmul.
# =====================================================================================
def _context_kernel(hatt_ref, tatt_ref, seq_ref, htatt_ref, rs_ref):
    nh = hatt_ref.shape[1]
    prod = hatt_ref[0, 0] * tatt_ref[0, 0]
    for h in range(1, nh):
        prod = prod + hatt_ref[0, h] * tatt_ref[0, h]
    prod = prod * (1.0 / nh)                                   # mean over heads
    denom = jnp.sum(prod, axis=1, keepdims=True) + 1e-30
    att = prod * pl.reciprocal(denom, approx=True)
    htatt_ref[0] = att
    rs_ref[0] = jnp.dot(att.astype(jnp.bfloat16),
                        seq_ref[0].astype(jnp.bfloat16),
                        preferred_element_type=jnp.float32)


def context_pool(h_att, t_att, seq, tile_pm):
    n, nh, pmax_pad, l = h_att.shape
    h = seq.shape[-1]
    grid = (n, pmax_pad // tile_pm)
    return pl.pallas_call(
        _context_kernel,
        grid=grid,
        in_specs=[
            pl.BlockSpec((1, nh, tile_pm, l), lambda b, p: (b, 0, p, 0)),
            pl.BlockSpec((1, nh, tile_pm, l), lambda b, p: (b, 0, p, 0)),
            pl.BlockSpec((1, l, h), lambda b, p: (b, 0, 0)),   # resident across pair axis
        ],
        out_specs=(
            pl.BlockSpec((1, tile_pm, l), lambda b, p: (b, p, 0)),
            pl.BlockSpec((1, tile_pm, h), lambda b, p: (b, p, 0)),
        ),
        out_shape=(
            jax.ShapeDtypeStruct((n, pmax_pad, l), jnp.float32),
            jax.ShapeDtypeStruct((n, pmax_pad, h), jnp.float32),
        ),
        compiler_params=pltpu.CompilerParams(
            dimension_semantics=("parallel", "parallel"),
            vmem_limit_bytes=VMEM_LIMIT),
    )(h_att, t_att, seq)


# =====================================================================================
# Fused relation kernel: stage-1 extractors + bilinear2 + graph row-mask +
#                        stage-2 extractors + bilinear + doc_prob add
# =====================================================================================
def _outer_features(a, b):
    # bl[p, g*B*B + i*B + j] = a[p, g*B+i] * b[p, g*B+j]
    # (matches torch (b1.unsqueeze(3)*b2.unsqueeze(2)).view(-1, E*B) ordering)
    group_slabs = []
    for g in range(GROUPS):
        a_g = a[:, g * BLOCK:(g + 1) * BLOCK]
        b_g = b[:, g * BLOCK:(g + 1) * BLOCK]
        parts = [a_g[:, i:i + 1] * b_g for i in range(BLOCK)]   # independent VPU mults
        group_slabs.append(jnp.concatenate(parts, axis=1))      # (P, B*B)
    return jnp.concatenate(group_slabs, axis=1)                 # (P, EMB*BLOCK) = (P,1024)


def _rel_fused_kernel(max_written,
                      hs_ref, ts_ref, rs_ref, docp_ref,
                      w1_ref, b1_ref, wb2_ref, bb2_ref,
                      w2_ref, b2_ref, wbil_ref, bbil_ref,
                      out_ref):
    tp = hs_ref.shape[0]
    bf16 = jnp.bfloat16
    hs, ts, rs = hs_ref[...], ts_ref[...], rs_ref[...]

    # stage-1 extractors: head+tail fused in one K=192, N=128 matmul
    x1 = jnp.concatenate([hs, ts, rs], axis=1).astype(bf16)
    z1 = jnp.tanh(jnp.dot(x1, w1_ref[...], preferred_element_type=jnp.float32)
                  + b1_ref[...])
    hs1, ts1 = z1[:, :EMB], z1[:, EMB:]

    # grouped bilinear #1 (bilinear2): one K=1024 matmul, output padded to 128 lanes
    bl1 = _outer_features(hs1, ts1).astype(bf16)
    hts_full = (jnp.dot(bl1, wb2_ref[...], preferred_element_type=jnp.float32)
                + bb2_ref[...])

    # graph_hts write-back semantics with identity graph layers:
    # rows >= max(batch_rel) are zeroed.
    # TODO(synk): AttentionGCNLayer is an external undefined module; applied as identity.
    row = (pl.program_id(0) * tp
           + jax.lax.broadcasted_iota(jnp.int32, (tp, 1), 0))
    hts_m = jnp.where(row < max_written, hts_full, 0.0)

    # stage-2 extractors: head+tail fused in one K=320, N=128 matmul
    x2 = jnp.concatenate([hs1, ts1, rs, hts_m], axis=1).astype(bf16)
    z2 = jnp.tanh(jnp.dot(x2, w2_ref[...], preferred_element_type=jnp.float32)
                  + b2_ref[...])
    hs2, ts2 = z2[:, :EMB], z2[:, EMB:]

    # grouped bilinear #2 (bilinear) + fused doc_prob add; lane-dense (P,128) output
    bl2 = _outer_features(hs2, ts2).astype(bf16)
    logits = (jnp.dot(bl2, wbil_ref[...], preferred_element_type=jnp.float32)
              + bbil_ref[...])
    out_ref[...] = logits + docp_ref[...]


def rel_forward(hs_p, ts_p, rs_p, docp_p, pw, max_written, tile_p):
    p_pad = hs_p.shape[0]
    grid = (p_pad // tile_p,)

    def full(arr):
        return pl.BlockSpec(arr.shape, lambda i: (0, 0))

    return pl.pallas_call(
        functools.partial(_rel_fused_kernel, max_written),
        grid=grid,
        in_specs=[
            pl.BlockSpec((tile_p, HIDDEN), lambda i: (i, 0)),
            pl.BlockSpec((tile_p, HIDDEN), lambda i: (i, 0)),
            pl.BlockSpec((tile_p, HIDDEN), lambda i: (i, 0)),
            pl.BlockSpec((tile_p, LANE), lambda i: (i, 0)),
            full(pw['w1']), full(pw['b1']), full(pw['wb2']), full(pw['bb2']),
            full(pw['w2']), full(pw['b2']), full(pw['wbil']), full(pw['bbil']),
        ],
        out_specs=pl.BlockSpec((tile_p, LANE), lambda i: (i, 0)),
        out_shape=jax.ShapeDtypeStruct((p_pad, LANE), jnp.float32),
        compiler_params=pltpu.CompilerParams(
            dimension_semantics=("parallel",),
            vmem_limit_bytes=VMEM_LIMIT),
    )(hs_p, ts_p, rs_p, docp_p,
      pw['w1'], pw['b1'], pw['wb2'], pw['bb2'],
      pw['w2'], pw['b2'], pw['wbil'], pw['bbil'])


# =====================================================================================
# Weight packing (done once in the wrapper): fold concatenations into block-structured
# weights, pad bilinear/classifier output widths to 128 lanes, cast matmul weights bf16.
# =====================================================================================
def _pack_rel_weights(params):
    f32, bf16 = jnp.float32, jnp.bfloat16

    # stage 1: x1 = [hs | ts | rs] (192) -> [hs1 | ts1] (128)
    w1 = jnp.zeros((3 * HIDDEN, 2 * EMB), f32)
    w1 = w1.at[0:HIDDEN, 0:EMB].set(params['wh'][0:HIDDEN])                 # hs -> head
    w1 = w1.at[HIDDEN:2 * HIDDEN, EMB:2 * EMB].set(params['wt'][0:HIDDEN])  # ts -> tail
    w1 = w1.at[2 * HIDDEN:, 0:EMB].set(params['wh'][HIDDEN:])               # rs -> head
    w1 = w1.at[2 * HIDDEN:, EMB:2 * EMB].set(params['wt'][HIDDEN:])         # rs -> tail
    b1 = jnp.concatenate([params['bh'], params['bt']], axis=1)              # (1,128)

    # stage 2: x2 = [hs1 | ts1 | rs | hts_pad(128)] (320) -> [hs2 | ts2] (128)
    x2w = EMB + EMB + HIDDEN + LANE
    w2 = jnp.zeros((x2w, 2 * EMB), f32)
    w2 = w2.at[0:EMB, 0:EMB].set(params['wh2'][0:EMB])                       # hs1 -> head
    w2 = w2.at[EMB:2 * EMB, EMB:2 * EMB].set(params['wt2'][0:EMB])           # ts1 -> tail
    w2 = w2.at[2 * EMB:2 * EMB + HIDDEN, 0:EMB].set(params['wh2'][EMB:EMB + HIDDEN])
    w2 = w2.at[2 * EMB:2 * EMB + HIDDEN, EMB:2 * EMB].set(params['wt2'][EMB:EMB + HIDDEN])
    base = 2 * EMB + HIDDEN
    w2 = w2.at[base:base + HIDDEN, 0:EMB].set(params['wh2'][EMB + HIDDEN:])  # hts -> head
    w2 = w2.at[base:base + HIDDEN, EMB:2 * EMB].set(params['wt2'][EMB + HIDDEN:])
    b2 = jnp.concatenate([params['bh2'], params['bt2']], axis=1)             # (1,128)

    wb2 = jnp.zeros((EMB * BLOCK, LANE), f32).at[:, :HIDDEN].set(params['wb2'])
    bb2 = jnp.zeros((1, LANE), f32).at[:, :HIDDEN].set(params['bb2'])
    wbil = jnp.zeros((EMB * BLOCK, LANE), f32).at[:, :NUM_CLASS].set(params['wbil'])
    bbil = jnp.zeros((1, LANE), f32).at[:, :NUM_CLASS].set(params['bbil'])

    return dict(w1=w1.astype(bf16), b1=b1,
                wb2=wb2.astype(bf16), bb2=bb2,
                w2=w2.astype(bf16), b2=b2,
                wbil=wbil.astype(bf16), bbil=bbil)


# =====================================================================================
# Plain-JAX glue
# =====================================================================================
def atloss_get_label(logits, num_labels=-1):
    # Standard ATLoss.get_label (ATLOP): class 0 is the adaptive threshold.
    th = logits[:, 0:1]
    mask = logits > th
    if num_labels > 0:
        top_v = jax.lax.top_k(logits, num_labels)[0][:, -1:]
        mask = mask & (logits >= top_v)
    out = jnp.where(mask, 1.0, 0.0).astype(logits.dtype)
    out = out.at[:, 0].set((out.sum(axis=1) == 0.0).astype(logits.dtype))
    return out


def init_params(key):
    ks = jax.random.split(key, 14)

    def lin(kw, kb, fin, fout):
        # stored as W.T: (in, out); y = x @ w + b  (== nn.Linear(x))
        w = 0.02 * jax.random.normal(kw, (fin, fout), jnp.float32)
        b = 0.02 * jax.random.normal(kb, (1, fout), jnp.float32)
        return w, b

    params = {}
    params['wh'], params['bh'] = lin(ks[0], ks[1], 2 * HIDDEN, EMB)        # head_extractor
    params['wt'], params['bt'] = lin(ks[2], ks[3], 2 * HIDDEN, EMB)        # tail_extractor
    params['wh2'], params['bh2'] = lin(ks[4], ks[5], 3 * HIDDEN, EMB)      # head_extractor2
    params['wt2'], params['bt2'] = lin(ks[6], ks[7], 3 * HIDDEN, EMB)      # tail_extractor2
    params['wbil'], params['bbil'] = lin(ks[8], ks[9], EMB * BLOCK, NUM_CLASS)   # bilinear
    params['wb2'], params['bb2'] = lin(ks[10], ks[11], EMB * BLOCK, HIDDEN)      # bilinear2
    params['wc'], params['bc'] = lin(ks[12], ks[13], HIDDEN, NUM_CLASS)          # classifier
    return params


def docre_forward(params, sequence_output, attention, entity_pos, hts, hts_graph,
                  tag='infer'):
    # TODO(synk): encode() (pretrained-LM + process_long_input) has no Pallas equivalent;
    # sequence_output / attention are taken as inputs (synthetic encoder outputs).
    offset = 1  # bert
    n, L, H = sequence_output.shape
    nH = attention.shape[1]
    output = {}

    doc_cls = sequence_output[:, 0, :]

    # ---------------- get_hrt: entity gathering (host-side glue) ----------------
    hs_list, ts_list, hatt_list, tatt_list, batch_rel = [], [], [], [], []
    for i in range(n):
        embs, atts = [], []
        for e in entity_pos[i]:
            if len(e) > 1:
                e_emb, e_att = [], []
                for (start, end) in e:
                    if start + offset < L:
                        e_emb.append(sequence_output[i, start + offset])
                        e_att.append(attention[i, :, start + offset])
                if len(e_emb) > 0:
                    emb = logsumexp(jnp.stack(e_emb, 0), axis=0)
                    att = jnp.stack(e_att, 0).mean(0)
                else:
                    emb = jnp.zeros((H,), jnp.float32)
                    att = jnp.zeros((nH, L), jnp.float32)
            else:
                start, end = e[0]
                if start + offset < L:
                    emb = sequence_output[i, start + offset]
                    att = attention[i, :, start + offset]
                else:
                    emb = jnp.zeros((H,), jnp.float32)
                    att = jnp.zeros((nH, L), jnp.float32)
            embs.append(emb)
            atts.append(att)
        entity_embs = jnp.stack(embs, 0)        # (n_ent, H)
        entity_atts = jnp.stack(atts, 0)        # (n_ent, nH, L)
        ht = np.asarray(hts[i], dtype=np.int32)
        hs_list.append(entity_embs[ht[:, 0]])
        ts_list.append(entity_embs[ht[:, 1]])
        hatt_list.append(entity_atts[ht[:, 0]])
        tatt_list.append(entity_atts[ht[:, 1]])
        batch_rel.append(len(hts[i]))

    pmax = max(batch_rel)
    tile_pm = min(256, _round_up(pmax, 8))      # use 128 on v7x (64 MiB VMEM, 2 TCs)
    pmax_pad = _round_up(pmax, tile_pm)

    # heads-leading layout (n, nH, Pmax, L) for full-lane vreg occupancy in the kernel
    def _prep_att(a):
        a = jnp.transpose(a, (1, 0, 2))                          # (nH, P_i, L)
        return jnp.pad(a, ((0, 0), (0, pmax_pad - a.shape[1]), (0, 0)))
    h_att = jnp.stack([_prep_att(a) for a in hatt_list], 0)       # (n, nH, Pmax, L)
    t_att = jnp.stack([_prep_att(a) for a in tatt_list], 0)

    # ---------------- localized context pooling (Pallas kernel) ----------------
    ht_att_b, rs_b = context_pool(h_att, t_att, sequence_output, tile_pm)

    hs = jnp.concatenate(hs_list, 0)                              # (T, H)
    ts = jnp.concatenate(ts_list, 0)
    rs = jnp.concatenate([rs_b[i, :batch_rel[i]] for i in range(n)], 0)
    doc_attn = jnp.concatenate([ht_att_b[i, :batch_rel[i]] for i in range(n)], 0)

    # ---------------- doc classifier: tiny (n,H)@(H,C) + sigmoid, plain XLA --------
    doc_logits = jnp.dot(doc_cls, params['wc']) + params['bc']
    doc_prob = jax.nn.sigmoid(doc_logits)

    t_total = hs.shape[0]
    tile_p = min(256, _round_up(t_total, 8))    # use 128 on v7x
    p_pad = _round_up(t_total, tile_p)

    hs_p = _pad_rows(hs, p_pad)
    ts_p = _pad_rows(ts, p_pad)
    rs_p = _pad_rows(rs, p_pad)

    # doc_prob rows (repeat_interleave) padded lane-dense and folded into the kernel
    batch_ids = np.repeat(np.arange(n), batch_rel)
    docp_p = jnp.zeros((p_pad, LANE), jnp.float32)
    docp_p = docp_p.at[:t_total, :NUM_CLASS].set(doc_prob[batch_ids])

    # ---------------- fused forward_rel (stage1 + graph mask + stage2) ----------------
    pw = _pack_rel_weights(params)
    logits_full = rel_forward(hs_p, ts_p, rs_p, docp_p, pw,
                              max_written=max(batch_rel), tile_p=tile_p)
    logits = logits_full[:t_total, :NUM_CLASS]

    output['rel_pred'] = atloss_get_label(logits, num_labels=-1)

    if tag == 'infer':
        starts = np.concatenate([[0], np.cumsum(batch_rel)])
        output['attns'] = [doc_attn[int(starts[i]):int(starts[i + 1])] for i in range(n)]
    # TODO(synk): loss branches (ATLoss forward, KLDiv evidence loss, BCE doc loss) and
    # forward_evi are skipped: labels / sent_labels / doc_rel are None and tag='infer'.
    return output


# =====================================================================================
if __name__ == "__main__":
    key = jax.random.PRNGKey(0)
    k_seq, k_att, k_par = jax.random.split(key, 3)

    n = 2
    sequence_output = jax.random.normal(k_seq, (n, DOC_LEN, HIDDEN), jnp.float32)
    attention = jax.nn.softmax(
        jax.random.normal(k_att, (n, NUM_HEADS, DOC_LEN, DOC_LEN), jnp.float32), axis=-1)

    # entity mention spans per batch (start, end), token offsets within the document
    entity_pos = [
        [[(2, 4), (10, 12)], [(5, 6)], [(20, 22), (40, 42)]],
        [[(3, 5)], [(15, 18), (60, 62)], [(80, 83)]],
    ]
    # all ordered entity pairs per batch
    hts = [[[i, j] for i in range(3) for j in range(3) if i != j] for _ in range(n)]
    # dummy 'entity_overlap' adjacency graphs (unused: graph layers are identity, see TODO)
    hts_graph = [np.eye(len(h), dtype=np.float32) for h in hts]

    params = init_params(k_par)

    out = docre_forward(params, sequence_output, attention, entity_pos, hts, hts_graph,
                        tag='infer')
    jax.block_until_ready(out['rel_pred'])
    jax.block_until_ready(out['attns'][0])
    print("KERNEL_OK")
</pallas_src>

<mosaic_0001>
module attributes {stable_mosaic.version = 11 : i64} {
  func.func @_context_kernel(%arg0: i32, %arg1: i32, %arg2: memref<1x2x8x128xf32, #tpu.memory_space<vmem>>, %arg3: memref<1x2x8x128xf32, #tpu.memory_space<vmem>>, %arg4: memref<1x128x64xf32, #tpu.memory_space<vmem>>, %arg5: memref<1x8x128xf32, #tpu.memory_space<vmem>>, %arg6: memref<1x8x64xf32, #tpu.memory_space<vmem>>) attributes {dimension_semantics = [#tpu.dimension_semantics<parallel>, #tpu.dimension_semantics<parallel>], iteration_bounds = array<i64: 2, 1>, scalar_prefetch = 0 : i64, scratch_operands = 0 : i64, tpu.core_type = #tpu.core_type<tc>, window_params = [{transform_indices = @transform_0, window_bounds = array<i64: 1, 2, 8, 128>}, {transform_indices = @transform_1, window_bounds = array<i64: 1, 2, 8, 128>}, {transform_indices = @transform_2, window_bounds = array<i64: 1, 128, 64>}, {transform_indices = @transform_3, window_bounds = array<i64: 1, 8, 128>}, {transform_indices = @transform_4, window_bounds = array<i64: 1, 8, 64>}]} {
    %c0 = arith.constant 0 : index
    %c0_0 = arith.constant 0 : index
    %c0_1 = arith.constant 0 : index
    %c0_2 = arith.constant 0 : index
    %0 = vector.load %arg2[%c0, %c0_0, %c0_1, %c0_2] : memref<1x2x8x128xf32, #tpu.memory_space<vmem>>, vector<1x1x8x128xf32>
    %1 = vector.shape_cast %0 : vector<1x1x8x128xf32> to vector<8x128xf32>
    %c0_3 = arith.constant 0 : index
    %c0_4 = arith.constant 0 : index
    %c0_5 = arith.constant 0 : index
    %c0_6 = arith.constant 0 : index
    %2 = vector.load %arg3[%c0_3, %c0_4, %c0_5, %c0_6] : memref<1x2x8x128xf32, #tpu.memory_space<vmem>>, vector<1x1x8x128xf32>
    %3 = vector.shape_cast %2 : vector<1x1x8x128xf32> to vector<8x128xf32>
    %4 = arith.mulf %1, %3 : vector<8x128xf32>
    %c0_7 = arith.constant 0 : index
    %c1 = arith.constant 1 : index
    %c0_8 = arith.constant 0 : index
    %c0_9 = arith.constant 0 : index
    %5 = vector.load %arg2[%c0_7, %c1, %c0_8, %c0_9] : memref<1x2x8x128xf32, #tpu.memory_space<vmem>>, vector<1x1x8x128xf32>
    %6 = vector.shape_cast %5 : vector<1x1x8x128xf32> to vector<8x128xf32>
    %c0_10 = arith.constant 0 : index
    %c1_11 = arith.constant 1 : index
    %c0_12 = arith.constant 0 : index
    %c0_13 = arith.constant 0 : index
    %7 = vector.load %arg3[%c0_10, %c1_11, %c0_12, %c0_13] : memref<1x2x8x128xf32, #tpu.memory_space<vmem>>, vector<1x1x8x128xf32>
    %8 = vector.shape_cast %7 : vector<1x1x8x128xf32> to vector<8x128xf32>
    %9 = arith.mulf %6, %8 : vector<8x128xf32>
    %10 = arith.addf %4, %9 : vector<8x128xf32>
    %cst = arith.constant 5.000000e-01 : f32
    %11 = vector.broadcast %cst : f32 to vector<8x128xf32>
    %12 = arith.mulf %10, %11 : vector<8x128xf32>
    %cst_14 = arith.constant dense<0.000000e+00> : vector<8xf32>
    %13 = vector.multi_reduction <add>, %12, %cst_14 [1] : vector<8x128xf32> to vector<8xf32>
    %14 = vector.shape_cast %13 : vector<8xf32> to vector<8x1xf32>
    %cst_15 = arith.constant 1.000000e-30 : f32
    %15 = vector.broadcast %cst_15 : f32 to vector<8x1xf32>
    %16 = arith.addf %14, %15 : vector<8x1xf32>
    %17 = tpu.reciprocal %16 {approx = true} : vector<8x1xf32> -> vector<8x1xf32>
    %18 = vector.broadcast %17 : vector<8x1xf32> to vector<8x128xf32>
    %19 = arith.mulf %12, %18 : vector<8x128xf32>
    %c0_16 = arith.constant 0 : index
    %c0_17 = arith.constant 0 : index
    %c0_18 = arith.constant 0 : index
    %20 = vector.load %arg5[%c0_16, %c0_17, %c0_18] : memref<1x8x128xf32, #tpu.memory_space<vmem>>, vector<1x8x128xf32>
    %21 = vector.shape_cast %20 : vector<1x8x128xf32> to vector<8x128xf32>
    %22 = vector.shape_cast %19 : vector<8x128xf32> to vector<1x8x128xf32>
    tpu.vector_store %arg5[%c0_16, %c0_17, %c0_18], %22 {strides = array<i32>} : memref<1x8x128xf32, #tpu.memory_space<vmem>>, vector<1x8x128xf32>,
    %23 = arith.truncf %19 : vector<8x128xf32> to vector<8x128xbf16>
    %c0_19 = arith.constant 0 : index
    %c0_20 = arith.constant 0 : index
    %c0_21 = arith.constant 0 : index
    %24 = vector.load %arg4[%c0_19, %c0_20, %c0_21] : memref<1x128x64xf32, #tpu.memory_space<vmem>>, vector<1x128x64xf32>
    %25 = vector.shape_cast %24 : vector<1x128x64xf32> to vector<128x64xf32>
    %26 = arith.truncf %25 : vector<128x64xf32> to vector<128x64xbf16>
    %cst_22 = arith.constant dense<0.000000e+00> : vector<8x64xf32>
    %27 = tpu.matmul %23, %26, %cst_22 {dimension_numbers = #tpu.dot_dimension_numbers<[1], [0], [0], [1], [0, 0, 1, 1], [], []>} : vector<8x128xbf16>, vector<128x64xbf16>, vector<8x64xf32> -> vector<8x64xf32>
    %c0_23 = arith.constant 0 : index
    %c0_24 = arith.constant 0 : index
    %c0_25 = arith.constant 0 : index
    %28 = vector.load %arg6[%c0_23, %c0_24, %c0_25] : memref<1x8x64xf32, #tpu.memory_space<vmem>>, vector<1x8x64xf32>
    %29 = vector.shape_cast %28 : vector<1x8x64xf32> to vector<8x64xf32>
    %30 = vector.shape_cast %27 : vector<8x64xf32> to vector<1x8x64xf32>
    tpu.vector_store %arg6[%c0_23, %c0_24, %c0_25], %30 {strides = array<i32>} : memref<1x8x64xf32, #tpu.memory_space<vmem>>, vector<1x8x64xf32>,
    return
  }
  func.func @transform_0(%arg0: i32, %arg1: i32) -> (i32, i32, i32, i32) {
    %c0_i32 = arith.constant 0 : i32
    %c0_i32_0 = arith.constant 0 : i32
    %c0_i32_1 = arith.constant 0 : i32
    return %arg0, %c0_i32, %arg1, %c0_i32_0 : i32, i32, i32, i32
  }
  func.func @transform_1(%arg0: i32, %arg1: i32) -> (i32, i32, i32, i32) {
    %c0_i32 = arith.constant 0 : i32
    %c0_i32_0 = arith.constant 0 : i32
    %c0_i32_1 = arith.constant 0 : i32
    return %arg0, %c0_i32, %arg1, %c0_i32_0 : i32, i32, i32, i32
  }
  func.func @transform_2(%arg0: i32, %arg1: i32) -> (i32, i32, i32) {
    %c0_i32 = arith.constant 0 : i32
    %c0_i32_0 = arith.constant 0 : i32
    %c0_i32_1 = arith.constant 0 : i32
    return %arg0, %c0_i32, %c0_i32_0 : i32, i32, i32
  }
  func.func @transform_3(%arg0: i32, %arg1: i32) -> (i32, i32, i32) {
    %c0_i32 = arith.constant 0 : i32
    %c0_i32_0 = arith.constant 0 : i32
    return %arg0, %arg1, %c0_i32 : i32, i32, i32
  }
  func.func @transform_4(%arg0: i32, %arg1: i32) -> (i32, i32, i32) {
    %c0_i32 = arith.constant 0 : i32
    %c0_i32_0 = arith.constant 0 : i32
    return %arg0, %arg1, %c0_i32 : i32, i32, i32
  }
}

</mosaic_0001>

<bundles_post_ra>
// kernel: tpu_custom_call.1
= control target key start
LH: loop header
LB: loop body
LE: loop exit
PB: predicated region body
PF: predicated region fallthrough
CT: control target
= control target key end

     0   :  { %10 = vsyncpa [#allocation3], 0  ;;  %s878_s0 = inlined_call_operand.vmem [shape: f32[2,2,8,128], index: 0, kind: input, shape index: {}]   ;;  %s879_s1 = inlined_call_operand.vmem [shape: f32[2,2,8,128], index: 1, kind: input, shape index: {}]   ;;  %s880_s2 = inlined_call_operand.vmem [shape: f32[2,128,64], index: 2, kind: input, shape index: {}]   ;;  %s881_s3 = inlined_call_operand.hbm [shape: f32[2,8,128], index: 3, kind: output, shape index: {0}]   ;;  %s882_s4 = inlined_call_operand.hbm [shape: f32[2,8,64], index: 4, kind: output, shape index: {1}]  }
   0x1   :  { %12 = vsyncpa [#allocation3 + $0x1], 0 }
   0x2   :  { %13 = vsyncpa [#allocation5], 0 }
   0x3   :  { %15 = vsyncpa [#allocation5 + $0x1], 0  ;;  %s739_s15 = smov 0   ;;  %s741_s16 = smov 0  }
   0x4   :  { %s743_s17 = smov 0   ;;  %s745_s18 = smov 0  }
   0x5   :  { %s747_s19 = smov 0   ;;  %s749_s20 = smov 0  }
   0x6 LB: > { %s516_s21 = sadd.s32 4294967295, %s712_s20   ;;  %s517_s22 = sadd.s32 4294967294, %s712_s20   ;;  %s712_s20 = sphi %s749_s20, %s21_s20   ;;  %s708_s19 = sphi %s747_s19, %s889_s19   ;;  %s704_s18 = sphi %s745_s18, %s888_s18   ;;  %s700_s17 = sphi %s743_s17, %s887_s17   ;;  %s696_s16 = sphi %s741_s16, %s886_s16   ;;  %s692_s15 = sphi %s739_s15, %s885_s15  }
   0x7   : > { %s33_s23 = sadd.s32 1, %s708_s19  ;;  %s124_s24 = sadd.s32 1, %s700_s17 }
   0x8   : > { %p35_p0 = scmp.ge.s32.totalorder %s33_s23, 2  ;;  %p134_p1 = scmp.ne.s32.totalorder %s700_s17, %s696_s16 }
   0x9   : > { %p135_p2 = scmp.eq.s32.totalorder %s516_s21, 1  ;;  %p140_p3 = scmp.ne.s32.totalorder %s696_s16, %s692_s15 }
   0xa   : > { %s891_s23 = smov (%p35_p0, %s33_s23), 0  ;;  %p141_p5 = scmp.eq.s32.totalorder %s517_s22, 1 }
   0xb   : > { %p779_p4 = por %p135_p2, %p134_p1  ;;  %s119_s26 = ssub.s32 %s708_s19, %s891_s23 }
   0xc   : > { %p520_p6 = scmp.ge.s32.totalorder %s712_s20, 1  ;;  %p122_p7 = scmp.eq.s32.totalorder %s119_s26, 0 }
   0xd   : > { %p786_p8 = por %p141_p5, %p140_p3  ;;  %p217_p9 = scmp.lt.s32.totalorder %s712_s20, 3 }
   0xe   : > { %s792_s28 = scalar_select %p122_p7, %s700_s17, %s124_s24  }
   0xf   : > { %p218_p10 = pnand %p520_p6, %p217_p9 }
  0x10   : > { %p264_p11 = scmp.lt.s32.totalorder (!%p218_p10), %s704_s18, 1  ;;  %s824_s21 = sand.u32 (!%p218_p10), 1, %s696_s16  }
  0x11   : > { %221 = sbr.rel (%p218_p10) target bundleno = 297 (0x129), region = 32  ;;  %s521_s22 = sshll.u32 (!%p218_p10), %s824_s21, 3 }
  0x12   : > { %s256_s24 = scalar_lea.vmem (!%p218_p10), [#allocation2], %s521_s22  ;;  %s533_s26 = sshll.u32 (!%p218_p10), %s704_s18, 3 }
  0x13   : > { %s360_s6 = sshll.u32 (!%p218_p10), %s256_s24, 4  ;;  %s361_s6 = int_to_ptr.vmem [resolvable:$true] %s360_s6 }
  0x16   : > { %s265_s29 = scalar_select %p264_p11, %s704_s18, 1 }
  0x17   : > { %s622_s18 = scalar_lea.hbm %s881_s3, 16 }
  0x18   : > { %s537_s30 = sshll.u32 %s265_s29, 4  ;;  %s539_s5 = sshll.u32 %s265_s29, 7 }
  0x19   : > { %s271_s8 = scalar_lea.vmem %s878_s0, %s537_s30  ;;  %s279_s11 = scalar_lea.vmem %s879_s1, %s537_s30 }
  0x1a   : > { %s805_s14 = scalar_lea.vmem %s880_s2, %s539_s5  ;;  %v285_v0 = vld [vmem:[%s271_s8] sm:$0xff]  ;;  %v529_v2 = vld [vmem:[%s271_s8 + $0x8] sm:$0xff]  ;;  %s358_s5 = scalar_lea.hbm %s881_s3, %s533_s26 }
  0x1b   : > { %v286_v1 = vld [vmem:[%s279_s11] sm:$0xff]  ;;  %v530_v4 = vld [vmem:[%s279_s11 + $0x8] sm:$0xff]  ;;  %v316_v5 = vld [vmem:[%s805_s14 + $0x70] sm:$0xff]  ;;  %s362_s7 = sshll.u32 %s358_s5, 4  ;;  %s342_s8 = scalar_lea.sflag [#allocation3], %s824_s21  ;;  %s363_s7 = int_to_ptr.hbm [resolvable:$true] %s362_s7 }
  0x1c   : > { %v287_v3 = vmul.f32 %v286_v1, %v285_v0  ;;  %v317_v6 = vld [vmem:[%s805_s14 + $0x78] sm:$0xff]  ;;  %v292_v7 = vmul.f32 %v530_v4, %v529_v2  ;;  %v314_v9 = vld [vmem:[%s805_s14 + $0x60] sm:$0xff]  ;;  %v315_v10 = vld [vmem:[%s805_s14 + $0x68] sm:$0xff]  ;;  %s616_s9 = sshra.s32 %s363_s7, 4  ;;  %s617_s9 = int_to_ptr.hbm [resolvable:$true] %s616_s9 }
  0x1d   : > { %v325_v8 = vpack.c.bf16 %v317_v6, %v316_v5  ;;  %v324_v12 = vpack.c.bf16 %v315_v10, %v314_v9  ;;  %v312_v13 = vld [vmem:[%s805_s14 + $0x50] sm:$0xff]  ;;  %v313_v14 = vld [vmem:[%s805_s14 + $0x58] sm:$0xff]  ;;  %v310_v17 = vld [vmem:[%s805_s14 + $0x40] sm:$0xff]  ;;  %s618_s10 = scalar_lea.hbm %s617_s9, 8  ;;  %p623_p1 = scmp.lt.s32.totalorder %s617_s9, %s881_s3 }
  0x1e   : > { %v293_v11 = vadd.f32 %v292_v7, %v287_v3  ;;  %v323_v16 = vpack.c.bf16 %v313_v14, %v312_v13  ;;  %v311_v18 = vld [vmem:[%s805_s14 + $0x48] sm:$0xff]  ;;  %v308_v20 = vld [vmem:[%s805_s14 + $0x30] sm:$0xff]  ;;  %v309_v21 = vld [vmem:[%s805_s14 + $0x38] sm:$0xff]  ;;  %p619_p12 = scmp.ne.s32.totalorder %s617_s9, %s618_s10  ;;  %p624_p2 = scmp.lt.s32.totalorder %s622_s18, %s618_s10 }
  0x1f   : > { %326 = vmatpush.bf16.msra.mxu0 %v325_v8  ;;  %v322_v19 = vpack.c.bf16 %v311_v18, %v310_v17  ;;  %v321_v22 = vpack.c.bf16 %v309_v21, %v308_v20  ;;  %v306_v23 = vld [vmem:[%s805_s14 + $0x20] sm:$0xff]  ;;  %v307_v24 = vld [vmem:[%s805_s14 + $0x28] sm:$0xff]  ;;  %v304_v26 = vld [vmem:[%s805_s14 + $0x10] sm:$0xff] }
  0x20   : > { %v294_v15 = vmul.f32 0.5, %v293_v11  ;;  %v320_v25 = vpack.c.bf16 %v307_v24, %v306_v23  ;;  %v305_v27 = vld [vmem:[%s805_s14 + $0x18] sm:$0xff]  ;;  %v302_v29 = vld [vmem:[%s805_s14] sm:$0xff]  ;;  %v303_v30 = vld [vmem:[%s805_s14 + $0x8] sm:$0xff]  ;;  %p620_p13 = pnand %p619_p12, %p779_p4  ;;  %p625_p3 = por %p624_p2, %p623_p1 }
  0x21   : > { %v319_v28 = vpack.c.bf16 %v305_v27, %v304_v26  ;;  %v318_v31 = vpack.c.bf16 %v303_v30, %v302_v29 }
  0x22   : > { %295 = vadd.xlane.f32.xlu0 %v294_v15  ;;  %p621_p0 = pneg %p620_p13 }
  0x23   : > { %327 = vmatpush.bf16.msra.mxu0 %v324_v12 }
  0x24   : > { %p626_p5 = pnand %p625_p3, %p621_p0 }
  0x27   : > { %328 = vmatpush.bf16.msra.mxu0 %v323_v16 }
  0x2b   : > { %329 = vmatpush.bf16.msra.mxu0 %v322_v19 }
  0x2f   : > { %330 = vmatpush.bf16.msra.mxu0 %v321_v22 }
  0x33   : > { %331 = vmatpush.bf16.msra.mxu0 %v320_v25 }
  0x37   : > { %332 = vmatpush.bf16.msra.mxu0 %v319_v28 }
  0x3b   : > { %333 = vmatpush.bf16.msra.mxu0 %v318_v31 }
  0x95   : > { %v296_v32 = vpop.xlane.xlu0 %295 }
  0x96   : > { %v297_v33 = vadd.f32 1e-30, %v296_v32 }
  0x98   : > { %600 = vrcp.f32 %v297_v33 }
  0x9e   : > { %v601_v34 = vpop.eup %600 }
  0x9f   : > { %v299_v35 = vmul.f32 %v601_v34, %v294_v15 }
  0xa1   : > { %v301_v36 = vpack.c.bf16 %v299_v35, %v299_v35  ;;  %300 = vst [vmem:[%s256_s24] sm:$0xff] %v299_v35 }
  0xa3   : > { %334 = vmatmul.bf16.vlgmr.msra.gmra.mxu0 %v301_v36 }
  0xa4   : > { %629 = shalt.err (!%p626_p5)
}
  0xa5   : > { %540 = dma.vmem_to_hbm [thread:$0]  (%p779_p4), %s361_s6, 128, %s363_s7, %s342_s8   ;;  %vm339_vm0 = vcmask 523264  }
  0xa6   : > { %s373_s30 = scalar_lea.hbm %s882_s4, %s533_s26  ;;  %s263_s5 = scalar_lea.vmem [#allocation4], %s521_s22 }
  0xa7   : > { %s375_s11 = sshll.u32 %s263_s5, 4  ;;  %s377_s12 = sshll.u32 %s373_s30, 4  ;;  %s376_s11 = int_to_ptr.vmem [resolvable:$true] %s375_s11  ;;  %s378_s12 = int_to_ptr.hbm [resolvable:$true] %s377_s12 }
  0xa8   : > { %s347_s9 = scalar_lea.sflag [#allocation5], %s824_s21  ;;  %s644_s10 = sshra.s32 %s378_s12, 4  ;;  %s645_s10 = int_to_ptr.hbm [resolvable:$true] %s644_s10 }
  0xa9   : > { %s646_s18 = scalar_lea.hbm %s645_s10, 8  ;;  %s650_s26 = scalar_lea.hbm %s882_s4, 16 }
  0xaa   : > { %p647_p6 = scmp.ne.s32.totalorder %s645_s10, %s646_s18  ;;  %p651_p10 = scmp.lt.s32.totalorder %s645_s10, %s882_s4 }
  0xab   : > { %p652_p11 = scmp.lt.s32.totalorder %s650_s26, %s646_s18 }
  0xac   : > { %p648_p7 = pnand %p647_p6, %p779_p4 }
  0xad   : > { %p653_p12 = por %p652_p11, %p651_p10 }
  0xae   : > { %p649_p9 = pneg %p648_p7 }
  0xb0   : > { %p654_p13 = pnand %p653_p12, %p649_p9 }
 0x120   : > { %v335_v37 = vpop.f32.mrf.mxu0 }
 0x121   : > { %340 = vst.msk [vmem:[%s263_s5] sm:$0xff] %vm339_vm0, %v335_v37 }
 0x122   : > { %657 = shalt.err (!%p654_p13)
}
 0x123   : > { %541 = dma.vmem_to_hbm [thread:$0]  (%p779_p4), %s376_s11, 128, %s378_s12, %s347_s9  }
 0x128   : > { %v337_v38 = vpop.f32.mrf.mxu0 }
 0x129 PF: > { %p551_p0 = scmp.ge.s32.totalorder %s712_s20, 2  ;;  %s389_s21 = sand.u32 1, %s692_s15  }
 0x12a   : > { %s390_s13 = scalar_lea.sflag [#allocation3], %s389_s21 }
 0x12b   : > { %p545_p1 = pnand %p551_p0, %p786_p8 }
 0x12d   : > { %p546_p2 = pneg %p545_p1 }
 0x12f   : > { %683 = dma.done.wait (%p546_p2), %s390_s13, 128  }
 0x130   : > { %685 = vsyncadd (%p546_p2), %s390_s13, 4294967168  ;;  %s400_s14 = scalar_lea.sflag [#allocation5], %s389_s21 }
 0x131   : > { %687 = dma.done.wait (%p546_p2), %s400_s14, 128  }
 0x132   : > { %689 = vsyncadd (%p546_p2), %s400_s14, 4294967168  ;;  %s21_s20 = sadd.s32 1, %s712_s20   ;;  %s885_s15 = smov %s696_s16 }
 0x133   : > { %p18_p3 = scmp.ge.s32.totalorder %s21_s20, 4   ;;  %s886_s16 = smov %s700_s17 }
 0x134   : > { %s887_s17 = smov %s792_s28  ;;  %s888_s18 = smov %s708_s19 }
 0x135   : > { %s889_s19 = smov %s891_s23  ;;  %20 = sbr.rel (!%p18_p3) target bundleno = 6 (0x6), region = 92 }
 0x13a   :  { %406 = vsyncpa [#allocation3], 1 }
 0x13b   :  { %408 = vsyncpa [#allocation3 + $0x1], 1 }
 0x13c   :  { %409 = vsyncpa [#allocation5], 1 }
 0x13d   :  { %411 = vsyncpa [#allocation5 + $0x1], 1 }

</bundles_post_ra>
